<compile_context>
chip_gen: v5e
topology: v5e:2x2
jax: 0.10.0
libtpu: 0.0.40
codegen_flags: <defaults>
</compile_context>

<pallas_src>
import jax
import jax.numpy as jnp
from jax.experimental import pallas as pl
from jax.experimental.pallas import tpu as pltpu


def _agg2_kernel(params_ref, x1_ref, x2_ref, out_ref):
    # params_ref lives in SMEM: [w0, w1, bias] (the 1x1 conv weights + bias).
    w0 = params_ref[0]
    w1 = params_ref[1]
    b = params_ref[2]
    out_ref[...] = (x1_ref[...] * w0 + x2_ref[...] * w1 + b).astype(out_ref.dtype)


def _choose_lane_dense_layout(n_total):
    """Pick (rows, lanes, pad) so the flat [rows, lanes] slab is lane-dense.

    Prefer the widest lane dim (multiple of 128) that still leaves >= 8 rows
    (full sublane utilization); fall back to any dividing width; finally pad
    the flat array up to a multiple of 128.
    """
    candidates = (2048, 1024, 512, 256, 128)
    best = None
    for L in candidates:
        if n_total % L == 0:
            if best is None:
                best = L
            if n_total // L >= 8:
                return n_total // L, L, 0
    if best is not None:
        return n_total // best, best, 0
    L = 128
    rows = -(-n_total // L)
    return rows, L, rows * L - n_total


def agg2_forward(x1, x2, conv_weight, conv_bias):
    """Pallas implementation of Agg2.forward with layer = Conv2d(2, 1, kernel_size=1).

    x1, x2      : [B, C, W, H] float32 (or bf16)
    conv_weight : [1, 2, 1, 1] float32 (PyTorch Conv2d weight shape)
    conv_bias   : [1]          float32
    returns     : [B, C, W, H] same dtype as x1
    """
    assert x1.shape == x2.shape
    B, C, W, H = x1.shape
    n_total = B * C * W * H
    dtype = x1.dtype
    itemsize = jnp.dtype(dtype).itemsize

    # Lane-dense flattening (elementwise op, so any consistent flattening is exact).
    rows, lanes, pad = _choose_lane_dense_layout(n_total)
    x1_flat = x1.reshape(-1)
    x2_flat = x2.reshape(-1)
    if pad:
        x1_flat = jnp.pad(x1_flat, (0, pad))
        x2_flat = jnp.pad(x2_flat, (0, pad))
    x1_2d = x1_flat.reshape(rows, lanes)
    x2_2d = x2_flat.reshape(rows, lanes)

    # Pack the 1x1-conv params into a tiny scalar vector for SMEM.
    params = jnp.concatenate(
        [conv_weight.reshape(-1).astype(jnp.float32),
         conv_bias.reshape(-1).astype(jnp.float32)]
    )  # shape (3,): [w0, w1, bias]

    # ~2 MiB per input block: 3 streams x 2 pipeline buffers stays well inside
    # scoped VMEM on all of v5e / v6e / v7x.
    target_block_bytes = 2 * 1024 * 1024
    block_rows = max(8, target_block_bytes // (lanes * itemsize))
    block_rows = int(min(block_rows, rows))
    if block_rows < rows:
        block_rows = max(8, (block_rows // 8) * 8)  # keep (8, 128) tiling happy

    grid = (pl.cdiv(rows, block_rows),)

    cost = pl.CostEstimate(
        flops=4 * n_total,            # 2 muls + 2 adds per element
        transcendentals=0,
        bytes_accessed=3 * n_total * itemsize,  # read x1, x2; write out
    )

    out_2d = pl.pallas_call(
        _agg2_kernel,
        out_shape=jax.ShapeDtypeStruct((rows, lanes), dtype),
        grid=grid,
        in_specs=[
            pl.BlockSpec(memory_space=pltpu.SMEM),              # params (scalars)
            pl.BlockSpec((block_rows, lanes), lambda i: (i, 0)),  # x1 tile
            pl.BlockSpec((block_rows, lanes), lambda i: (i, 0)),  # x2 tile
        ],
        out_specs=pl.BlockSpec((block_rows, lanes), lambda i: (i, 0)),
        compiler_params=pltpu.CompilerParams(
            dimension_semantics=("parallel",),
        ),
        cost_estimate=cost,
    )(params, x1_2d, x2_2d)

    out_flat = out_2d.reshape(-1)
    if pad:
        out_flat = out_flat[:n_total]
    return out_flat.reshape(B, C, W, H)


def agg2_reference(x1, x2, conv_weight, conv_bias):
    # Pure-JAX reference mirroring the PyTorch forward (1x1 conv over 2 "item" channels).
    w0 = conv_weight[0, 0, 0, 0]
    w1 = conv_weight[0, 1, 0, 0]
    b = conv_bias[0]
    return x1 * w0 + x2 * w1 + b


if __name__ == "__main__":
    key = jax.random.PRNGKey(0)
    k1, k2, kw, kb = jax.random.split(key, 4)

    B, C, W, H = 2, 4, 16, 16
    x1 = jax.random.normal(k1, (B, C, W, H), dtype=jnp.float32)
    x2 = jax.random.normal(k2, (B, C, W, H), dtype=jnp.float32)

    # Deterministic init for layer = nn.Conv2d(2, 1, kernel_size=1, bias=True)
    conv_weight = jax.random.normal(kw, (1, 2, 1, 1), dtype=jnp.float32) * 0.5
    conv_bias = jax.random.normal(kb, (1,), dtype=jnp.float32) * 0.1

    out = agg2_forward(x1, x2, conv_weight, conv_bias)
    out = jax.block_until_ready(out)

    ref = agg2_reference(x1, x2, conv_weight, conv_bias)
    assert out.shape == (B, C, W, H)
    assert jnp.allclose(out, ref, atol=1e-5, rtol=1e-5)

    print("KERNEL_OK")
</pallas_src>

<mosaic_0001>
module attributes {stable_mosaic.version = 11 : i64} {
  func.func @_agg2_kernel(%arg0: i32, %arg1: memref<3xf32, #tpu.memory_space<smem>>, %arg2: memref<8x256xf32, #tpu.memory_space<vmem>>, %arg3: memref<8x256xf32, #tpu.memory_space<vmem>>, %arg4: memref<8x256xf32, #tpu.memory_space<vmem>>) attributes {dimension_semantics = [#tpu.dimension_semantics<parallel>], iteration_bounds = array<i64: 1>, scalar_prefetch = 0 : i64, scratch_operands = 0 : i64, tpu.core_type = #tpu.core_type<tc>, window_params = [{transform_indices = @transform_0, window_bounds = array<i64: 3>}, {transform_indices = @transform_1, window_bounds = array<i64: 8, 256>}, {transform_indices = @transform_2, window_bounds = array<i64: 8, 256>}, {transform_indices = @transform_3, window_bounds = array<i64: 8, 256>}]} {
    %c0 = arith.constant 0 : index
    %0 = memref.load %arg1[%c0] : memref<3xf32, #tpu.memory_space<smem>>
    %c1 = arith.constant 1 : index
    %1 = memref.load %arg1[%c1] : memref<3xf32, #tpu.memory_space<smem>>
    %c2 = arith.constant 2 : index
    %2 = memref.load %arg1[%c2] : memref<3xf32, #tpu.memory_space<smem>>
    %c0_0 = arith.constant 0 : index
    %c0_1 = arith.constant 0 : index
    %3 = vector.load %arg2[%c0_0, %c0_1] : memref<8x256xf32, #tpu.memory_space<vmem>>, vector<8x256xf32>
    %4 = vector.broadcast %0 : f32 to vector<8x256xf32>
    %5 = arith.mulf %3, %4 : vector<8x256xf32>
    %c0_2 = arith.constant 0 : index
    %c0_3 = arith.constant 0 : index
    %6 = vector.load %arg3[%c0_2, %c0_3] : memref<8x256xf32, #tpu.memory_space<vmem>>, vector<8x256xf32>
    %7 = vector.broadcast %1 : f32 to vector<8x256xf32>
    %8 = arith.mulf %6, %7 : vector<8x256xf32>
    %9 = arith.addf %5, %8 : vector<8x256xf32>
    %10 = vector.broadcast %2 : f32 to vector<8x256xf32>
    %11 = arith.addf %9, %10 : vector<8x256xf32>
    %c0_4 = arith.constant 0 : index
    %c0_5 = arith.constant 0 : index
    %12 = vector.load %arg4[%c0_4, %c0_5] : memref<8x256xf32, #tpu.memory_space<vmem>>, vector<8x256xf32>
    tpu.vector_store %arg4[%c0_4, %c0_5], %11 {strides = array<i32>} : memref<8x256xf32, #tpu.memory_space<vmem>>, vector<8x256xf32>,
    return
  }
  func.func @transform_0(%arg0: i32) -> i32 {
    %c0_i32 = arith.constant 0 : i32
    %c0_i32_0 = arith.constant 0 : i32
    return %c0_i32 : i32
  }
  func.func @transform_1(%arg0: i32) -> (i32, i32) {
    %c0_i32 = arith.constant 0 : i32
    %c0_i32_0 = arith.constant 0 : i32
    return %arg0, %c0_i32 : i32, i32
  }
  func.func @transform_2(%arg0: i32) -> (i32, i32) {
    %c0_i32 = arith.constant 0 : i32
    %c0_i32_0 = arith.constant 0 : i32
    return %arg0, %c0_i32 : i32, i32
  }
  func.func @transform_3(%arg0: i32) -> (i32, i32) {
    %c0_i32 = arith.constant 0 : i32
    %c0_i32_0 = arith.constant 0 : i32
    return %arg0, %c0_i32 : i32, i32
  }
}

</mosaic_0001>

<bundles_post_ra>
// kernel: tpu_custom_call.1
= control target key start
LH: loop header
LB: loop body
LE: loop exit
PB: predicated region body
PF: predicated region fallthrough
CT: control target
= control target key end

     0   :  { %8 = vsyncpa [#allocation5], 0  ;;  %s229_s0 = inlined_call_operand.hbm [shape: f32[3], index: 0, kind: input, shape index: {}]   ;;  %s230_s1 = inlined_call_operand.hbm [shape: f32[8,256], index: 1, kind: input, shape index: {}]   ;;  %s231_s2 = inlined_call_operand.hbm [shape: f32[8,256], index: 2, kind: input, shape index: {}]   ;;  %s232_s3 = inlined_call_operand.hbm [shape: f32[8,256], index: 3, kind: output, shape index: {}]  }
   0x1   :  { %9 = vsyncpa [#allocation3], 0 }
   0x2   :  { %10 = vsyncpa [#allocation8], 0 }
   0x3   :  { %11 = vsyncpa [#allocation4], 0  ;;  %s17_s14 = sshll.u32 %s229_s0, 4  ;;  %s26_s17 = sshll.u32 %s230_s1, 4  ;;  %s18_s14 = int_to_ptr.hbm [resolvable:$true] %s17_s14  ;;  %s27_s17 = int_to_ptr.hbm [resolvable:$true] %s26_s17 }
   0x4   :  { %s193_s18 = smov [#allocation2]   ;;  %s194_s19 = smov [#allocation6]  }
   0x5   :  { %20 = dma.hbm_to_smem %s18_s14, 16, %s193_s18, [#allocation5]  }
   0x6   :  { %s28_s20 = sshll.u32 %s194_s19, 4  ;;  %s37_s23 = sshll.u32 %s231_s2, 4  ;;  %s29_s20 = int_to_ptr.vmem [resolvable:$true] %s28_s20  ;;  %s38_s23 = int_to_ptr.hbm [resolvable:$true] %s37_s23 }
   0x7   :  { %31 = dma.hbm_to_vmem [thread:$0]  %s27_s17, 256, %s29_s20, [#allocation3]  }
   0x8   :  { %s195_s24 = smov [#allocation7]  }
   0x9   :  { %s39_s25 = sshll.u32 %s195_s24, 4  ;;  %s40_s25 = int_to_ptr.vmem [resolvable:$true] %s39_s25 }
   0xa   :  { %42 = dma.hbm_to_vmem [thread:$0]  %s38_s23, 256, %s40_s25, [#allocation8]  }
   0xb   :  { %185 = dma.done.wait [#allocation5], 16  }
   0xc   :  { %186 = vsyncadd [#allocation5], 4294967280 }
   0xd   :  { %187 = dma.done.wait [#allocation3], 256  }
   0xe   :  { %188 = vsyncadd [#allocation3], 4294967040 }
   0xf   :  { %189 = dma.done.wait [#allocation8], 256  }
  0x10   :  { %190 = vsyncadd [#allocation8], 4294967040 }
  0x11   :  { %55 = sfence }
  0x12   :  { %s56_s0 = sld [smem:[#allocation2]]  ;;  %v59_v0 = vld [vmem:[#allocation6] sm:$0xff]  ;;  %v60_v1 = vld [vmem:[#allocation6 + $0x8] sm:$0xff]  ;;  %v64_v2 = vld [vmem:[#allocation7] sm:$0xff]  ;;  %s196_s2 = smov [#allocation9]  }
  0x13   :  { %s95_s1 = sld [smem:[#allocation2 + $0x1]]  ;;  %v65_v3 = vld [vmem:[#allocation7 + $0x8] sm:$0xff]  ;;  %s81_s27 = sshll.u32 %s196_s2, 4  ;;  %s82_s27 = int_to_ptr.vmem [resolvable:$true] %s81_s27 }
  0x14   :  { %s96_s26 = sld [smem:[#allocation2 + $0x2]]  ;;  %s83_s30 = sshll.u32 %s232_s3, 4  ;;  %s84_s30 = int_to_ptr.hbm [resolvable:$true] %s83_s30 }
  0x18   :  { %v61_v4 = vstv %s56_s0 }
  0x19   :  { %v62_v5 = vmul.f32 %v61_v4, %v59_v0  ;;  %v66_v6 = vstv %s95_s1  ;;  %v63_v7 = vmul.f32 %v61_v4, %v60_v1 }
  0x1a   :  { %v67_v8 = vmul.f32 %v66_v6, %v64_v2  ;;  %v68_v9 = vmul.f32 %v66_v6, %v65_v3  ;;  %v71_v10 = vstv %s96_s26 }
  0x1c   :  { %v69_v11 = vadd.f32 %v67_v8, %v62_v5  ;;  %v70_v12 = vadd.f32 %v68_v9, %v63_v7 }
  0x1e   :  { %v72_v13 = vadd.f32 %v71_v10, %v69_v11  ;;  %v73_v14 = vadd.f32 %v71_v10, %v70_v12 }
  0x20   :  { %74 = vst [vmem:[#allocation9] sm:$0xff] %v72_v13 }
  0x21   :  { %75 = vst [vmem:[#allocation9 + $0x8] sm:$0xff] %v73_v14 }
  0x22   :  { %86 = dma.vmem_to_hbm [thread:$0]  %s82_s27, 256, %s84_s30, [#allocation4]  }
  0x23   :  { %191 = dma.done.wait [#allocation4], 256  }
  0x24   :  { %192 = vsyncadd [#allocation4], 4294967040 }
  0x25   :  { %91 = vsyncpa [#allocation3], 1 }
  0x26   :  { %92 = vsyncpa [#allocation8], 1 }
  0x27   :  { %93 = vsyncpa [#allocation4], 1 }
  0x28   :  { %94 = vsyncpa [#allocation5], 1 }

</bundles_post_ra>
